<compile_context>
chip_gen: v5e
topology: v5e:2x2
jax: 0.10.0
libtpu: 0.0.40
codegen_flags: <defaults>
</compile_context>

<pallas_src>
import functools

import jax
import jax.numpy as jnp
from jax import lax
from jax.experimental import pallas as pl
from jax.experimental.pallas import tpu as pltpu


# ----------------------------------------------------------------------------
# Fused kernel: [conv3x3 + GuidedBackpropReLU fwd] x 2 for the whole batch,
# single invocation (no grid).
# ----------------------------------------------------------------------------
def _fused_conv_guided_relu_kernel(x_ref, w1_ref, w2_ref, b1_ref, b2_ref,
                                   o_ref, lhs1_ref, h1p_ref, lhs2_ref,
                                   *, N, H, k1, k2):
    # x_ref  : (N*Hp1, Cin*W)   per-image height-padded rows, images stacked on M
    # w1_ref : (k1*Cin*W, C1*W) height taps stacked along K; the width conv and
    #                           width zero-padding are baked into the band
    # w2_ref : (k2*C1*W,  C2*W)
    # b1_ref : (1, C1*W), b2_ref: (1, C2*W)   biases broadcast over width
    # o_ref  : (N*H, C2*W)      lane-dense output rows (128 lanes here)
    # lhs1_ref: VMEM (N*H, k1*Cin*W)  K-merged layer-1 LHS
    # h1p_ref : VMEM (N*Hp2, C1*W)    layer-1 activation, per-image H-padded
    # lhs2_ref: VMEM (N*H, k2*C1*W)   K-merged layer-2 LHS
    CinW = x_ref.shape[1]
    C1W = h1p_ref.shape[1]
    p2 = k2 // 2
    Hp1 = H + 2 * (k1 // 2)
    Hp2 = H + 2 * p2

    # ---- layer 1: assemble K-merged height taps, then ONE MXU matmul ----
    for n in range(N):
        for t in range(k1):
            lhs1_ref[pl.ds(n * H, H), pl.ds(t * CinW, CinW)] = (
                x_ref[pl.ds(n * Hp1 + t, H), :])
    acc1 = jnp.dot(lhs1_ref[...], w1_ref[...],
                   preferred_element_type=jnp.float32)
    # GuidedBackpropReLUFunction.forward == input.clamp(min=0)
    h1 = jnp.maximum(acc1 + b1_ref[...], 0.0)

    # ---- stage h1 with per-image zero height padding (pad rows only) ----
    zrow = jnp.zeros((p2, C1W), jnp.float32)           # hoisted out of the loop
    for n in range(N):
        h1p_ref[pl.ds(n * Hp2, p2), :] = zrow                       # top pad
        h1p_ref[pl.ds(n * Hp2 + p2 + H, p2), :] = zrow              # bottom pad
        h1p_ref[pl.ds(n * Hp2 + p2, H), :] = h1[n * H:(n + 1) * H, :]

    # ---- layer 2: same structure, reading the VMEM-resident activation ----
    for n in range(N):
        for t in range(k2):
            lhs2_ref[pl.ds(n * H, H), pl.ds(t * C1W, C1W)] = (
                h1p_ref[pl.ds(n * Hp2 + t, H), :])
    acc2 = jnp.dot(lhs2_ref[...], w2_ref[...],
                   preferred_element_type=jnp.float32)
    o_ref[...] = jnp.maximum(acc2 + b2_ref[...], 0.0).astype(o_ref.dtype)


# ----------------------------------------------------------------------------
# Weight prep (runs ONCE in __init__): fold the width-conv and width
# zero-padding into banded matrices and stack the kh height taps along K so
# each conv layer is a single matmul in the kernel:
#   out_rows[h] = concat_ih(in_rows_hpadded[h + ih]) @ band_stacked
#   band[ih, ci*W + w_src, co*W + w_dst] = weight[co, ci, ih, w_src - w_dst + pad]
#                                          (zero when the tap falls outside 0..kw)
# ----------------------------------------------------------------------------
def _band_weights_kstacked(weight, W):
    C_out, C_in, kh, kw = weight.shape
    pad = kw // 2
    src = jnp.arange(W)[:, None]          # input column within a row (w_src)
    dst = jnp.arange(W)[None, :]          # output column             (w_dst)
    tap = src - dst + pad                 # width tap index iw
    valid = ((tap >= 0) & (tap < kw)).astype(weight.dtype)
    tap = jnp.clip(tap, 0, kw - 1)
    band = weight[:, :, :, tap] * valid[None, None, None]   # (Co, Ci, kh, W, W)
    band = band.transpose(2, 1, 3, 0, 4)                    # (kh, Ci, Wsrc, Co, Wdst)
    return band.reshape(kh * C_in * W, C_out * W)           # K-stacked taps


# ----------------------------------------------------------------------------
# GuidedBackpropReLUModel: synthetic wrapped model
#   Sequential(Conv2d(4, 8, 3, pad=1), GuidedReLU, Conv2d(8, 8, 3, pad=1),
#              GuidedReLU)
# ----------------------------------------------------------------------------
class GuidedBackpropReLUModelPallas:
    # TODO(synk): only the forward pass is implemented; GuidedBackpropReLU's
    # custom backward (guided gradient masking) is an autograd rule, not part
    # of the forward computation.

    def __init__(self, params, image_width):
        (w1, b1), (w2, b2) = params
        self.params = params
        self.c_in = int(w1.shape[1])
        self.c1 = int(w1.shape[0])
        self.c2 = int(w2.shape[0])
        self.k1 = int(w1.shape[2])
        self.k2 = int(w2.shape[2])
        self.W = int(image_width)
        assert self.k1 % 2 == 1 and self.k2 % 2 == 1, "SAME pad needs odd kernels"
        # Lane-dense tiles: keeps all matmul N dims and the output stores at
        # full 128-lane width (review correctness/perf concern).
        assert (self.c1 * self.W) % 128 == 0 and (self.c2 * self.W) % 128 == 0, (
            "channels*width must be a multiple of 128 for lane-dense tiles")
        # Hoisted out of the per-call path (perf review item #1): banded
        # weights + broadcast biases depend only on params and W.
        W = self.W
        self.w1k = _band_weights_kstacked(w1, W)     # (k1*Cin*W, C1*W)
        self.w2k = _band_weights_kstacked(w2, W)     # (k2*C1*W,  C2*W)
        self.b1r = jnp.repeat(b1, W)[None, :]        # (1, C1*W)
        self.b2r = jnp.repeat(b2, W)[None, :]        # (1, C2*W)

    def __call__(self, x):
        """x: (N, C_in, H, W) float32 NCHW; returns (N, C2, H, W)."""
        N, C_in, H, W = x.shape
        assert C_in == self.c_in and W == self.W
        k1, k2 = self.k1, self.k2
        p1, p2 = k1 // 2, k2 // 2
        Hp1, Hp2 = H + 2 * p1, H + 2 * p2
        CinW, C1W, C2W = C_in * W, self.c1 * W, self.c2 * W

        # NCHW -> stacked per-image rows (N*Hp1, Cin*W), zero height-pad rows.
        x_rows = jnp.transpose(x, (0, 2, 1, 3)).reshape(N, H, CinW)
        x_rows = jnp.pad(x_rows, ((0, 0), (p1, p1), (0, 0))).reshape(N * Hp1, CinW)

        kernel = functools.partial(_fused_conv_guided_relu_kernel,
                                   N=N, H=H, k1=k1, k2=k2)

        flops = 2 * (N * H) * (k1 * CinW * C1W + k2 * C1W * C2W)
        bytes_accessed = 4 * (x_rows.size + self.w1k.size + self.w2k.size
                              + self.b1r.size + self.b2r.size + N * H * C2W)

        out_rows = pl.pallas_call(
            kernel,
            out_shape=jax.ShapeDtypeStruct((N * H, C2W), x.dtype),
            scratch_shapes=[
                pltpu.VMEM((N * H, k1 * CinW), jnp.float32),   # layer-1 LHS
                pltpu.VMEM((N * Hp2, C1W), jnp.float32),       # padded h1
                pltpu.VMEM((N * H, k2 * C1W), jnp.float32),    # layer-2 LHS
            ],
            compiler_params=pltpu.CompilerParams(
                vmem_limit_bytes=32 * 1024 * 1024),
            cost_estimate=pl.CostEstimate(flops=int(flops), transcendentals=0,
                                          bytes_accessed=int(bytes_accessed)),
        )(x_rows, self.w1k, self.w2k, self.b1r, self.b2r)

        # (N*H, C2*W) -> NCHW
        return jnp.transpose(out_rows.reshape(N, H, self.c2, W), (0, 2, 1, 3))


def _reference_forward(x, params):
    """Pure-JAX reference (lax.conv) for correctness check."""
    out = x
    for w, b in params:
        out = lax.conv_general_dilated(
            out, w, window_strides=(1, 1), padding="SAME",
            dimension_numbers=("NCHW", "OIHW", "NCHW"))
        out = out + b.reshape(1, -1, 1, 1)
        out = jnp.maximum(out, 0.0)   # GuidedBackpropReLU forward
    return out


if __name__ == "__main__":
    key = jax.random.PRNGKey(0)
    k_x, k_w1, k_b1, k_w2, k_b2 = jax.random.split(key, 5)

    N, C_in, H, W = 2, 4, 16, 16
    C1, C2, K = 8, 8, 3

    x = jax.random.normal(k_x, (N, C_in, H, W), dtype=jnp.float32)
    w1 = 0.1 * jax.random.normal(k_w1, (C1, C_in, K, K), dtype=jnp.float32)
    b1 = 0.1 * jax.random.normal(k_b1, (C1,), dtype=jnp.float32)
    w2 = 0.1 * jax.random.normal(k_w2, (C2, C1, K, K), dtype=jnp.float32)
    b2 = 0.1 * jax.random.normal(k_b2, (C2,), dtype=jnp.float32)

    params = ((w1, b1), (w2, b2))
    model = GuidedBackpropReLUModelPallas(params, image_width=W)

    out = jax.jit(model.__call__)(x)
    out = jax.block_until_ready(out)

    ref = _reference_forward(x, params)
    assert out.shape == (N, C2, H, W), out.shape
    assert jnp.allclose(out, ref, atol=1e-4, rtol=1e-4), \
        float(jnp.max(jnp.abs(out - ref)))

    print("KERNEL_OK")
</pallas_src>

<mosaic_0001>
module attributes {stable_mosaic.version = 11 : i64} {
  func.func @_fused_conv_guided_relu_kernel(%arg0: memref<36x64xf32, #tpu.memory_space<vmem>>, %arg1: memref<192x128xf32, #tpu.memory_space<vmem>>, %arg2: memref<384x128xf32, #tpu.memory_space<vmem>>, %arg3: memref<1x128xf32, #tpu.memory_space<vmem>>, %arg4: memref<1x128xf32, #tpu.memory_space<vmem>>, %arg5: memref<32x128xf32, #tpu.memory_space<vmem>>, %arg6: memref<32x192xf32, #tpu.memory_space<vmem>>, %arg7: memref<36x128xf32, #tpu.memory_space<vmem>>, %arg8: memref<32x384xf32, #tpu.memory_space<vmem>>) attributes {dimension_semantics = [], scalar_prefetch = 0 : i64, scratch_operands = 3 : i64, tpu.core_type = #tpu.core_type<tc>} {
    %c0 = arith.constant 0 : index
    %c0_0 = arith.constant 0 : index
    %0 = vector.load %arg0[%c0, %c0_0] : memref<36x64xf32, #tpu.memory_space<vmem>>, vector<16x64xf32>
    %c0_1 = arith.constant 0 : index
    %c0_2 = arith.constant 0 : index
    %1 = vector.load %arg6[%c0_1, %c0_2] : memref<32x192xf32, #tpu.memory_space<vmem>>, vector<16x64xf32>
    tpu.vector_store %arg6[%c0_1, %c0_2], %0 {strides = array<i32>} : memref<32x192xf32, #tpu.memory_space<vmem>>, vector<16x64xf32>,
    %c1 = arith.constant 1 : index
    %c0_3 = arith.constant 0 : index
    %2 = vector.load %arg0[%c1, %c0_3] : memref<36x64xf32, #tpu.memory_space<vmem>>, vector<16x64xf32>
    %c0_4 = arith.constant 0 : index
    %c64 = arith.constant 64 : index
    %3 = vector.load %arg6[%c0_4, %c64] : memref<32x192xf32, #tpu.memory_space<vmem>>, vector<16x64xf32>
    tpu.vector_store %arg6[%c0_4, %c64], %2 {strides = array<i32>} : memref<32x192xf32, #tpu.memory_space<vmem>>, vector<16x64xf32>,
    %c2 = arith.constant 2 : index
    %c0_5 = arith.constant 0 : index
    %4 = vector.load %arg0[%c2, %c0_5] : memref<36x64xf32, #tpu.memory_space<vmem>>, vector<16x64xf32>
    %c0_6 = arith.constant 0 : index
    %c128 = arith.constant 128 : index
    %5 = vector.load %arg6[%c0_6, %c128] : memref<32x192xf32, #tpu.memory_space<vmem>>, vector<16x64xf32>
    tpu.vector_store %arg6[%c0_6, %c128], %4 {strides = array<i32>} : memref<32x192xf32, #tpu.memory_space<vmem>>, vector<16x64xf32>,
    %c18 = arith.constant 18 : index
    %c0_7 = arith.constant 0 : index
    %6 = vector.load %arg0[%c18, %c0_7] : memref<36x64xf32, #tpu.memory_space<vmem>>, vector<16x64xf32>
    %c16 = arith.constant 16 : index
    %c0_8 = arith.constant 0 : index
    %7 = vector.load %arg6[%c16, %c0_8] : memref<32x192xf32, #tpu.memory_space<vmem>>, vector<16x64xf32>
    tpu.vector_store %arg6[%c16, %c0_8], %6 {strides = array<i32>} : memref<32x192xf32, #tpu.memory_space<vmem>>, vector<16x64xf32>,
    %c19 = arith.constant 19 : index
    %c0_9 = arith.constant 0 : index
    %8 = vector.load %arg0[%c19, %c0_9] : memref<36x64xf32, #tpu.memory_space<vmem>>, vector<16x64xf32>
    %c16_10 = arith.constant 16 : index
    %c64_11 = arith.constant 64 : index
    %9 = vector.load %arg6[%c16_10, %c64_11] : memref<32x192xf32, #tpu.memory_space<vmem>>, vector<16x64xf32>
    tpu.vector_store %arg6[%c16_10, %c64_11], %8 {strides = array<i32>} : memref<32x192xf32, #tpu.memory_space<vmem>>, vector<16x64xf32>,
    %c20 = arith.constant 20 : index
    %c0_12 = arith.constant 0 : index
    %10 = vector.load %arg0[%c20, %c0_12] : memref<36x64xf32, #tpu.memory_space<vmem>>, vector<16x64xf32>
    %c16_13 = arith.constant 16 : index
    %c128_14 = arith.constant 128 : index
    %11 = vector.load %arg6[%c16_13, %c128_14] : memref<32x192xf32, #tpu.memory_space<vmem>>, vector<16x64xf32>
    tpu.vector_store %arg6[%c16_13, %c128_14], %10 {strides = array<i32>} : memref<32x192xf32, #tpu.memory_space<vmem>>, vector<16x64xf32>,
    %c0_15 = arith.constant 0 : index
    %c0_16 = arith.constant 0 : index
    %12 = vector.load %arg6[%c0_15, %c0_16] : memref<32x192xf32, #tpu.memory_space<vmem>>, vector<32x192xf32>
    %c0_17 = arith.constant 0 : index
    %c0_18 = arith.constant 0 : index
    %13 = vector.load %arg1[%c0_17, %c0_18] : memref<192x128xf32, #tpu.memory_space<vmem>>, vector<192x128xf32>
    %cst = arith.constant dense<0.000000e+00> : vector<32x128xf32>
    %14 = tpu.matmul %12, %13, %cst {dimension_numbers = #tpu.dot_dimension_numbers<[1], [0], [0], [1], [0, 0, 1, 1], [], []>} : vector<32x192xf32>, vector<192x128xf32>, vector<32x128xf32> -> vector<32x128xf32>
    %c0_19 = arith.constant 0 : index
    %c0_20 = arith.constant 0 : index
    %15 = vector.load %arg3[%c0_19, %c0_20] : memref<1x128xf32, #tpu.memory_space<vmem>>, vector<1x128xf32>
    %16 = vector.broadcast %15 : vector<1x128xf32> to vector<32x128xf32>
    %17 = arith.addf %14, %16 : vector<32x128xf32>
    %cst_21 = arith.constant 0.000000e+00 : f32
    %18 = vector.broadcast %cst_21 : f32 to vector<32x128xf32>
    %19 = arith.maximumf %17, %18 : vector<32x128xf32>
    %cst_22 = arith.constant 0.000000e+00 : f32
    %20 = vector.broadcast %cst_22 : f32 to vector<1x128xf32>
    %c0_23 = arith.constant 0 : index
    %c0_24 = arith.constant 0 : index
    %21 = vector.load %arg7[%c0_23, %c0_24] : memref<36x128xf32, #tpu.memory_space<vmem>>, vector<1x128xf32>
    tpu.vector_store %arg7[%c0_23, %c0_24], %20 {strides = array<i32>} : memref<36x128xf32, #tpu.memory_space<vmem>>, vector<1x128xf32>,
    %c17 = arith.constant 17 : index
    %c0_25 = arith.constant 0 : index
    %22 = vector.load %arg7[%c17, %c0_25] : memref<36x128xf32, #tpu.memory_space<vmem>>, vector<1x128xf32>
    tpu.vector_store %arg7[%c17, %c0_25], %20 {strides = array<i32>} : memref<36x128xf32, #tpu.memory_space<vmem>>, vector<1x128xf32>,
    %23 = vector.extract_strided_slice %19 {offsets = [0, 0], sizes = [16, 128], strides = [1, 1]} : vector<32x128xf32> to vector<16x128xf32>
    %c1_26 = arith.constant 1 : index
    %c0_27 = arith.constant 0 : index
    %24 = vector.load %arg7[%c1_26, %c0_27] : memref<36x128xf32, #tpu.memory_space<vmem>>, vector<16x128xf32>
    tpu.vector_store %arg7[%c1_26, %c0_27], %23 {strides = array<i32>} : memref<36x128xf32, #tpu.memory_space<vmem>>, vector<16x128xf32>,
    %c18_28 = arith.constant 18 : index
    %c0_29 = arith.constant 0 : index
    %25 = vector.load %arg7[%c18_28, %c0_29] : memref<36x128xf32, #tpu.memory_space<vmem>>, vector<1x128xf32>
    tpu.vector_store %arg7[%c18_28, %c0_29], %20 {strides = array<i32>} : memref<36x128xf32, #tpu.memory_space<vmem>>, vector<1x128xf32>,
    %c35 = arith.constant 35 : index
    %c0_30 = arith.constant 0 : index
    %26 = vector.load %arg7[%c35, %c0_30] : memref<36x128xf32, #tpu.memory_space<vmem>>, vector<1x128xf32>
    tpu.vector_store %arg7[%c35, %c0_30], %20 {strides = array<i32>} : memref<36x128xf32, #tpu.memory_space<vmem>>, vector<1x128xf32>,
    %27 = vector.extract_strided_slice %19 {offsets = [16, 0], sizes = [16, 128], strides = [1, 1]} : vector<32x128xf32> to vector<16x128xf32>
    %c19_31 = arith.constant 19 : index
    %c0_32 = arith.constant 0 : index
    %28 = vector.load %arg7[%c19_31, %c0_32] : memref<36x128xf32, #tpu.memory_space<vmem>>, vector<16x128xf32>
    tpu.vector_store %arg7[%c19_31, %c0_32], %27 {strides = array<i32>} : memref<36x128xf32, #tpu.memory_space<vmem>>, vector<16x128xf32>,
    %c0_33 = arith.constant 0 : index
    %c0_34 = arith.constant 0 : index
    %29 = vector.load %arg7[%c0_33, %c0_34] : memref<36x128xf32, #tpu.memory_space<vmem>>, vector<16x128xf32>
    %c0_35 = arith.constant 0 : index
    %c0_36 = arith.constant 0 : index
    %30 = vector.load %arg8[%c0_35, %c0_36] : memref<32x384xf32, #tpu.memory_space<vmem>>, vector<16x128xf32>
    tpu.vector_store %arg8[%c0_35, %c0_36], %29 {strides = array<i32>} : memref<32x384xf32, #tpu.memory_space<vmem>>, vector<16x128xf32>,
    %c1_37 = arith.constant 1 : index
    %c0_38 = arith.constant 0 : index
    %31 = vector.load %arg7[%c1_37, %c0_38] : memref<36x128xf32, #tpu.memory_space<vmem>>, vector<16x128xf32>
    %c0_39 = arith.constant 0 : index
    %c128_40 = arith.constant 128 : index
    %32 = vector.load %arg8[%c0_39, %c128_40] : memref<32x384xf32, #tpu.memory_space<vmem>>, vector<16x128xf32>
    tpu.vector_store %arg8[%c0_39, %c128_40], %31 {strides = array<i32>} : memref<32x384xf32, #tpu.memory_space<vmem>>, vector<16x128xf32>,
    %c2_41 = arith.constant 2 : index
    %c0_42 = arith.constant 0 : index
    %33 = vector.load %arg7[%c2_41, %c0_42] : memref<36x128xf32, #tpu.memory_space<vmem>>, vector<16x128xf32>
    %c0_43 = arith.constant 0 : index
    %c256 = arith.constant 256 : index
    %34 = vector.load %arg8[%c0_43, %c256] : memref<32x384xf32, #tpu.memory_space<vmem>>, vector<16x128xf32>
    tpu.vector_store %arg8[%c0_43, %c256], %33 {strides = array<i32>} : memref<32x384xf32, #tpu.memory_space<vmem>>, vector<16x128xf32>,
    %c18_44 = arith.constant 18 : index
    %c0_45 = arith.constant 0 : index
    %35 = vector.load %arg7[%c18_44, %c0_45] : memref<36x128xf32, #tpu.memory_space<vmem>>, vector<16x128xf32>
    %c16_46 = arith.constant 16 : index
    %c0_47 = arith.constant 0 : index
    %36 = vector.load %arg8[%c16_46, %c0_47] : memref<32x384xf32, #tpu.memory_space<vmem>>, vector<16x128xf32>
    tpu.vector_store %arg8[%c16_46, %c0_47], %35 {strides = array<i32>} : memref<32x384xf32, #tpu.memory_space<vmem>>, vector<16x128xf32>,
    %c19_48 = arith.constant 19 : index
    %c0_49 = arith.constant 0 : index
    %37 = vector.load %arg7[%c19_48, %c0_49] : memref<36x128xf32, #tpu.memory_space<vmem>>, vector<16x128xf32>
    %c16_50 = arith.constant 16 : index
    %c128_51 = arith.constant 128 : index
    %38 = vector.load %arg8[%c16_50, %c128_51] : memref<32x384xf32, #tpu.memory_space<vmem>>, vector<16x128xf32>
    tpu.vector_store %arg8[%c16_50, %c128_51], %37 {strides = array<i32>} : memref<32x384xf32, #tpu.memory_space<vmem>>, vector<16x128xf32>,
    %c20_52 = arith.constant 20 : index
    %c0_53 = arith.constant 0 : index
    %39 = vector.load %arg7[%c20_52, %c0_53] : memref<36x128xf32, #tpu.memory_space<vmem>>, vector<16x128xf32>
    %c16_54 = arith.constant 16 : index
    %c256_55 = arith.constant 256 : index
    %40 = vector.load %arg8[%c16_54, %c256_55] : memref<32x384xf32, #tpu.memory_space<vmem>>, vector<16x128xf32>
    tpu.vector_store %arg8[%c16_54, %c256_55], %39 {strides = array<i32>} : memref<32x384xf32, #tpu.memory_space<vmem>>, vector<16x128xf32>,
    %c0_56 = arith.constant 0 : index
    %c0_57 = arith.constant 0 : index
    %41 = vector.load %arg8[%c0_56, %c0_57] : memref<32x384xf32, #tpu.memory_space<vmem>>, vector<32x384xf32>
    %c0_58 = arith.constant 0 : index
    %c0_59 = arith.constant 0 : index
    %42 = vector.load %arg2[%c0_58, %c0_59] : memref<384x128xf32, #tpu.memory_space<vmem>>, vector<384x128xf32>
    %cst_60 = arith.constant dense<0.000000e+00> : vector<32x128xf32>
    %43 = tpu.matmul %41, %42, %cst_60 {dimension_numbers = #tpu.dot_dimension_numbers<[1], [0], [0], [1], [0, 0, 1, 1], [], []>} : vector<32x384xf32>, vector<384x128xf32>, vector<32x128xf32> -> vector<32x128xf32>
    %c0_61 = arith.constant 0 : index
    %c0_62 = arith.constant 0 : index
    %44 = vector.load %arg4[%c0_61, %c0_62] : memref<1x128xf32, #tpu.memory_space<vmem>>, vector<1x128xf32>
    %45 = vector.broadcast %44 : vector<1x128xf32> to vector<32x128xf32>
    %46 = arith.addf %43, %45 : vector<32x128xf32>
    %cst_63 = arith.constant 0.000000e+00 : f32
    %47 = vector.broadcast %cst_63 : f32 to vector<32x128xf32>
    %48 = arith.maximumf %46, %47 : vector<32x128xf32>
    %c0_64 = arith.constant 0 : index
    %c0_65 = arith.constant 0 : index
    %49 = vector.load %arg5[%c0_64, %c0_65] : memref<32x128xf32, #tpu.memory_space<vmem>>, vector<32x128xf32>
    tpu.vector_store %arg5[%c0_64, %c0_65], %48 {strides = array<i32>} : memref<32x128xf32, #tpu.memory_space<vmem>>, vector<32x128xf32>,
    return
  }
}

</mosaic_0001>

<bundles_post_ra>
// kernel: a_call__.1
= control target key start
LH: loop header
LB: loop body
LE: loop exit
PB: predicated region body
PF: predicated region fallthrough
CT: control target
= control target key end

     0   :  { %s391_s22 = smov 64   ;;  %vm22_vm0 = vcmask 523264   ;;  %vm35_vm1 = vcmask 1048064   ;;  %s709_s0 = inlined_call_operand.vmem [shape: f32[36,64], index: 0, kind: input, shape index: {}]   ;;  %s710_s1 = inlined_call_operand.vmem [shape: f32[192,128], index: 1, kind: input, shape index: {}]   ;;  %s711_s3 = inlined_call_operand.vmem [shape: f32[1,128], index: 3, kind: input, shape index: {}]   ;;  %s712_s2 = inlined_call_operand.vmem [shape: f32[384,128], index: 2, kind: input, shape index: {}]   ;;  %s713_s4 = inlined_call_operand.vmem [shape: f32[1,128], index: 4, kind: input, shape index: {}]   ;;  %s714_s5 = inlined_call_operand.vmem [shape: f32[32,128], index: 5, kind: output, shape index: {}]  }
   0x1   :  { %v25_v0 = vld [vmem:[%s709_s0 + $0x1] sm:$0xff]  ;;  %v46_v1 = vld [vmem:[%s709_s0 + $0x13] sm:$0xff]  ;;  %v26_v8 = vld [vmem:[%s709_s0 + $0x9] sm:$0xff] }
   0x2   :  { %29 = vrot.lane.b32.xlu0 %v25_v0, %s391_s22  ;;  %50 = vrot.lane.b32.xlu1 %v46_v1, %s391_s22  ;;  %v85_v2 = vld [vmem:[%s710_s1 + $0x78] sm:$0xff]  ;;  %v84_v3 = vld [vmem:[%s710_s1 + $0x70] sm:$0xff] }
   0x3   :  { %110 = vmatpush.msra.mxu0 %v85_v2  ;;  %v83_v4 = vld [vmem:[%s710_s1 + $0x68] sm:$0xff]  ;;  %v82_v5 = vld [vmem:[%s710_s1 + $0x60] sm:$0xff]  ;;  %v93_v6 = vld [vmem:[%s710_s1 + $0xb8] sm:$0xff] }
   0x4   :  { %v92_v7 = vld [vmem:[%s710_s1 + $0xb0] sm:$0xff]  ;;  %v47_v9 = vld [vmem:[%s709_s0 + $0x1b] sm:$0xff]  ;;  %147 = vmatpush.msra.mxu1 %v93_v6  ;;  %v91_v11 = vld [vmem:[%s710_s1 + $0xa8] sm:$0xff] }
   0x5   :  { %111 = vmatpush.msra.mxu0 %v84_v3  ;;  %v81_v10 = vld [vmem:[%s710_s1 + $0x58] sm:$0xff]  ;;  %v80_v12 = vld [vmem:[%s710_s1 + $0x50] sm:$0xff]  ;;  %v79_v13 = vld [vmem:[%s710_s1 + $0x48] sm:$0xff] }
   0x6   :  { %148 = vmatpush.msra.mxu1 %v92_v7  ;;  %v78_v14 = vld [vmem:[%s710_s1 + $0x40] sm:$0xff]  ;;  %v77_v15 = vld [vmem:[%s710_s1 + $0x38] sm:$0xff]  ;;  %v76_v16 = vld [vmem:[%s710_s1 + $0x30] sm:$0xff] }
   0x7   :  { %112 = vmatpush.msra.mxu0 %v83_v4  ;;  %v75_v17 = vld [vmem:[%s710_s1 + $0x28] sm:$0xff]  ;;  %v74_v18 = vld [vmem:[%s710_s1 + $0x20] sm:$0xff]  ;;  %v73_v20 = vld [vmem:[%s710_s1 + $0x18] sm:$0xff] }
   0x8   :  { %149 = vmatpush.msra.mxu1 %v91_v11  ;;  %v20_v19 = vld [vmem:[%s709_s0] sm:$0xff]  ;;  %v72_v22 = vld [vmem:[%s710_s1 + $0x10] sm:$0xff]  ;;  %v89_v23 = vld [vmem:[%s710_s1 + $0x98] sm:$0xff] }
   0x9   :  { %113 = vmatpush.msra.mxu0 %v82_v5  ;;  %23 = vst.msk [vmem:[#allocation2] sm:$0xff] %vm22_vm0, %v20_v19  ;;  %v90_v21 = vld [vmem:[%s710_s1 + $0xa0] sm:$0xff]  ;;  %v71_v24 = vld [vmem:[%s710_s1 + $0x8] sm:$0xff]  ;;  %v88_v25 = vld [vmem:[%s710_s1 + $0x90] sm:$0xff] }
   0xa   :  { %31 = vrot.lane.b32.xlu0 %v26_v8, %s391_s22  ;;  %52 = vrot.lane.b32.xlu1 %v47_v9, %s391_s22  ;;  %v38_v26 = vld [vmem:[%s709_s0 + $0x2] sm:$0xff]  ;;  %v42_v31 = vld [vmem:[%s709_s0 + $0x12] sm:$0xff] }
   0xb   :  { %114 = vmatpush.msra.mxu0 %v81_v10  ;;  %150 = vmatpush.msra.mxu1 %v90_v21  ;;  %40 = vst.msk [vmem:[#allocation2 + $0x8] sm:$0xff] %vm22_vm0, %v38_v26  ;;  %v70_v27 = vld [vmem:[%s710_s1] sm:$0xff]  ;;  %v87_v28 = vld [vmem:[%s710_s1 + $0x88] sm:$0xff]  ;;  %v58_v36 = vld [vmem:[%s709_s0 + $0x14] sm:$0xff] }
   0xc   :  { %v21_v29 = vld [vmem:[%s709_s0 + $0x8] sm:$0xff]  ;;  %v86_v30 = vld [vmem:[%s710_s1 + $0x80] sm:$0xff]  ;;  %44 = vst.msk [vmem:[#allocation2 + $0x20] sm:$0xff] %vm22_vm0, %v42_v31  ;;  %v231_v41 = vld [vmem:[%s712_s2 + $0x78] sm:$0xff] }
   0xd   :  { %115 = vmatpush.msra.mxu0 %v80_v12  ;;  %151 = vmatpush.msra.mxu1 %v89_v23  ;;  %24 = vst.msk [vmem:[#allocation2 + $0x10] sm:$0xff] %vm22_vm0, %v21_v29  ;;  %v39_v32 = vld [vmem:[%s709_s0 + $0xa] sm:$0xff]  ;;  %v43_v34 = vld [vmem:[%s709_s0 + $0x1a] sm:$0xff] }
   0xe   :  { %41 = vst.msk [vmem:[#allocation2 + $0x18] sm:$0xff] %vm22_vm0, %v39_v32  ;;  %v59_v38 = vld [vmem:[%s709_s0 + $0x1c] sm:$0xff]  ;;  %v230_v43 = vld [vmem:[%s712_s2 + $0x70] sm:$0xff]  ;;  %268 = vmatpush.msra.mxu2 %v231_v41  ;;  %v229_v46 = vld [vmem:[%s712_s2 + $0x68] sm:$0xff] }
   0xf   :  { %116 = vmatpush.msra.mxu0 %v79_v13  ;;  %152 = vmatpush.msra.mxu1 %v88_v25  ;;  %45 = vst.msk [vmem:[#allocation2 + $0x30] sm:$0xff] %vm22_vm0, %v43_v34  ;;  %v247_v42 = vld [vmem:[%s712_s2 + $0xf8] sm:$0xff]  ;;  %v246_v45 = vld [vmem:[%s712_s2 + $0xf0] sm:$0xff]  ;;  %v245_v47 = vld [vmem:[%s712_s2 + $0xe8] sm:$0xff] }
  0x10   :  { %60 = vst.msk [vmem:[#allocation2 + $0x28] sm:$0xff] %vm22_vm0, %v58_v36  ;;  %297 = vmatpush.msra.mxu3 %v247_v42  ;;  %269 = vmatpush.msra.mxu2 %v230_v43  ;;  %v263_v48 = vld [vmem:[%s712_s2 + $0x178] sm:$0xff]  ;;  %v228_v49 = vld [vmem:[%s712_s2 + $0x60] sm:$0xff]  ;;  %v262_v50 = vld [vmem:[%s712_s2 + $0x170] sm:$0xff] }
  0x11   :  { %117 = vmatpush.msra.mxu0 %v78_v14  ;;  %153 = vmatpush.msra.mxu1 %v87_v28  ;;  %61 = vst.msk [vmem:[#allocation2 + $0x38] sm:$0xff] %vm22_vm0, %v59_v38  ;;  %v244_v51 = vld [vmem:[%s712_s2 + $0xe0] sm:$0xff]  ;;  %v227_v52 = vld [vmem:[%s712_s2 + $0x58] sm:$0xff]  ;;  %v261_v53 = vld [vmem:[%s712_s2 + $0x168] sm:$0xff] }
  0x12   :  { %v63_v33 = vld [vmem:[#allocation2 + $0x8] sm:$0xff]  ;;  %298 = vmatpush.msra.mxu3 %v246_v45  ;;  %270 = vmatpush.msra.mxu2 %v229_v46  ;;  %v243_v57 = vld [vmem:[%s712_s2 + $0xd8] sm:$0xff]  ;;  %v226_v58 = vld [vmem:[%s712_s2 + $0x50] sm:$0xff] }
  0x13   :  { %118 = vmatpush.msra.mxu0 %v77_v15  ;;  %154 = vmatpush.msra.mxu1 %v86_v30  ;;  %v260_v59 = vld [vmem:[%s712_s2 + $0x160] sm:$0xff]  ;;  %v242_v60 = vld [vmem:[%s712_s2 + $0xd0] sm:$0xff]  ;;  %v225_v61 = vld [vmem:[%s712_s2 + $0x48] sm:$0xff] }
  0x14   :  { %367 = vmatmul.msk.f32.vlgmr.msra.gmra.mxu1 %vm22_vm0, %v63_v33  ;;  %299 = vmatpush.msra.mxu3 %v245_v47  ;;  %v241_v62 = vld [vmem:[%s712_s2 + $0xc8] sm:$0xff]  ;;  %v224_v63 = vld [vmem:[%s712_s2 + $0x40] sm:$0xff]  ;;  %v239_v4 = vld [vmem:[%s712_s2 + $0xb8] sm:$0xff] }
  0x15   :  { %119 = vmatpush.msra.mxu0 %v76_v16  ;;  %v65_v35 = vld [vmem:[#allocation2 + $0x18] sm:$0xff]  ;;  %371 = vmatpush.msrb.mxu1 %v263_v48  ;;  %v240_v0 = vld [vmem:[%s712_s2 + $0xc0] sm:$0xff]  ;;  %v238_v5 = vld [vmem:[%s712_s2 + $0xb0] sm:$0xff] }
  0x16   :  { %271 = vmatpush.msra.mxu2 %v228_v49  ;;  %300 = vmatpush.msra.mxu3 %v244_v51  ;;  %v237_v6 = vld [vmem:[%s712_s2 + $0xa8] sm:$0xff]  ;;  %v236_v7 = vld [vmem:[%s712_s2 + $0xa0] sm:$0xff]  ;;  %v223_v8 = vld [vmem:[%s712_s2 + $0x38] sm:$0xff] }
  0x17   :  { %120 = vmatpush.msra.mxu0 %v75_v17  ;;  %v67_v37 = vld [vmem:[#allocation2 + $0x28] sm:$0xff]  ;;  %372 = vmatpush.msrb.mxu1 %v262_v50  ;;  %v259_v9 = vld [vmem:[%s712_s2 + $0x158] sm:$0xff]  ;;  %v222_v11 = vld [vmem:[%s712_s2 + $0x30] sm:$0xff] }
  0x18   :  { %v69_v44 = vld [vmem:[#allocation2 + $0x38] sm:$0xff]  ;;  %272 = vmatpush.msra.mxu2 %v227_v52  ;;  %301 = vmatpush.msra.mxu3 %v243_v57  ;;  %v258_v12 = vld [vmem:[%s712_s2 + $0x150] sm:$0xff]  ;;  %v221_v14 = vld [vmem:[%s712_s2 + $0x28] sm:$0xff] }
  0x19   :  { %121 = vmatpush.msra.mxu0 %v74_v18  ;;  %373 = vmatpush.msrb.mxu1 %v261_v53  ;;  %v235_v10 = vld [vmem:[%s712_s2 + $0x98] sm:$0xff]  ;;  %v234_v13 = vld [vmem:[%s712_s2 + $0x90] sm:$0xff]  ;;  %v257_v15 = vld [vmem:[%s712_s2 + $0x148] sm:$0xff] }
  0x1a   :  { %273 = vmatpush.msra.mxu2 %v226_v58  ;;  %302 = vmatpush.msra.mxu3 %v242_v60  ;;  %v233_v16 = vld [vmem:[%s712_s2 + $0x88] sm:$0xff]  ;;  %v220_v17 = vld [vmem:[%s712_s2 + $0x20] sm:$0xff]  ;;  %v255_v21 = vld [vmem:[%s712_s2 + $0x138] sm:$0xff] }
  0x1b   :  { %122 = vmatpush.msra.mxu0 %v73_v20  ;;  %374 = vmatpush.msrb.mxu1 %v260_v59  ;;  %v256_v18 = vld [vmem:[%s712_s2 + $0x140] sm:$0xff]  ;;  %v219_v20 = vld [vmem:[%s712_s2 + $0x18] sm:$0xff]  ;;  %v218_v23 = vld [vmem:[%s712_s2 + $0x10] sm:$0xff] }
  0x1c   :  { %368 = vmatmul.msk.f32.gmra.mxu1 %vm22_vm0, %v65_v35  ;;  %274 = vmatpush.msra.mxu2 %v225_v61  ;;  %v232_v19 = vld [vmem:[%s712_s2 + $0x80] sm:$0xff]  ;;  %v217_v25 = vld [vmem:[%s712_s2 + $0x8] sm:$0xff]  ;;  %v251_v29 = vld [vmem:[%s712_s2 + $0x118] sm:$0xff] }
  0x1d   :  { %123 = vmatpush.msra.mxu0 %v72_v22  ;;  %303 = vmatpush.msra.mxu3 %v241_v62  ;;  %v392_v22 = vmov 0.0   ;;  %v253_v26 = vld [vmem:[%s712_s2 + $0x128] sm:$0xff]  ;;  %v252_v28 = vld [vmem:[%s712_s2 + $0x120] sm:$0xff]  ;;  %v250_v30 = vld [vmem:[%s712_s2 + $0x110] sm:$0xff] }
  0x1e   :  { %275 = vmatpush.msra.mxu2 %v224_v63  ;;  %375 = vmatpush.msrb.mxu1 %v259_v9  ;;  %172 = vst [vmem:[#allocation3] sm:$0x1] %v392_v22  ;;  %v249_v31 = vld [vmem:[%s712_s2 + $0x108] sm:$0xff]  ;;  %v248_v32 = vld [vmem:[%s712_s2 + $0x100] sm:$0xff] }
  0x1f   :  { %124 = vmatpush.msra.mxu0 %v71_v24  ;;  %304 = vmatpush.msra.mxu3 %v240_v0  ;;  %173 = vst [vmem:[#allocation3 + $0x11] sm:$0x1] %v392_v22  ;;  %v254_v24 = vld [vmem:[%s712_s2 + $0x130] sm:$0xff]  ;;  %v389_v34 = vld [vmem:[%s711_s3] ss:$0 sm:$0xff] }
  0x20   :  { %276 = vmatpush.msra.mxu2 %v223_v8  ;;  %376 = vmatpush.msrb.mxu1 %v258_v12  ;;  %176 = vst [vmem:[#allocation3 + $0x12] sm:$0x1] %v392_v22  ;;  %v390_v63 = vld [vmem:[%s713_s4] ss:$0 sm:$0xff] }
  0x21   :  { %125 = vmatpush.msra.mxu0 %v70_v27  ;;  %305 = vmatpush.msra.mxu3 %v239_v4  ;;  %177 = vst [vmem:[#allocation3 + $0x23] sm:$0x1] %v392_v22  ;;  %v216_v27 = vld [vmem:[%s712_s2] sm:$0xff] }
  0x22   :  { %277 = vmatpush.msra.mxu2 %v222_v11  ;;  %377 = vmatpush.msrb.mxu1 %v257_v15 }
  0x23   :  { %326 = vmatpush.msrb.mxu0 %v263_v48  ;;  %306 = vmatpush.msra.mxu3 %v238_v5 }
  0x24   :  { %369 = vmatmul.msk.f32.gmra.mxu1 %vm22_vm0, %v67_v37  ;;  %278 = vmatpush.msra.mxu2 %v221_v14 }
  0x25   :  { %327 = vmatpush.msrb.mxu0 %v262_v50  ;;  %307 = vmatpush.msra.mxu3 %v237_v6 }
  0x26   :  { %279 = vmatpush.msra.mxu2 %v220_v17  ;;  %378 = vmatpush.msrb.mxu1 %v256_v18 }
  0x27   :  { %328 = vmatpush.msrb.mxu0 %v261_v53  ;;  %308 = vmatpush.msra.mxu3 %v236_v7 }
  0x28   :  { %280 = vmatpush.msra.mxu2 %v219_v20  ;;  %379 = vmatpush.msrb.mxu1 %v255_v21 }
  0x29   :  { %329 = vmatpush.msrb.mxu0 %v260_v59  ;;  %309 = vmatpush.msra.mxu3 %v235_v10 }
  0x2a   :  { %281 = vmatpush.msra.mxu2 %v218_v23  ;;  %380 = vmatpush.msrb.mxu1 %v254_v24 }
  0x2b   :  { %330 = vmatpush.msrb.mxu0 %v259_v9  ;;  %310 = vmatpush.msra.mxu3 %v234_v13 }
  0x2c   :  { %370 = vmatmul.msk.f32.gmra.mxu1 %vm22_vm0, %v69_v44  ;;  %282 = vmatpush.msra.mxu2 %v217_v25 }
  0x2d   :  { %331 = vmatpush.msrb.mxu0 %v258_v12  ;;  %311 = vmatpush.msra.mxu3 %v233_v16 }
  0x2e   :  { %381 = vmatpush.msrb.mxu1 %v253_v26  ;;  %283 = vmatpush.msra.mxu2 %v216_v27 }
  0x2f   :  { %332 = vmatpush.msrb.mxu0 %v257_v15  ;;  %312 = vmatpush.msra.mxu3 %v232_v19 }
  0x30   :  { %382 = vmatpush.msrb.mxu1 %v252_v28 }
  0x31   :  { %333 = vmatpush.msrb.mxu0 %v256_v18 }
  0x32   :  { %383 = vmatpush.msrb.mxu1 %v251_v29 }
  0x33   :  { %334 = vmatpush.msrb.mxu0 %v255_v21 }
  0x34   :  { %384 = vmatpush.msrb.mxu1 %v250_v30 }
  0x35   :  { %335 = vmatpush.msrb.mxu0 %v254_v24 }
  0x36   :  { %385 = vmatpush.msrb.mxu1 %v249_v31 }
  0x37   :  { %336 = vmatpush.msrb.mxu0 %v253_v26 }
  0x38   :  { %386 = vmatpush.msrb.mxu1 %v248_v32 }
  0x39   :  { %337 = vmatpush.msrb.mxu0 %v252_v28 }
  0x3b   :  { %338 = vmatpush.msrb.mxu0 %v251_v29 }
  0x3d   :  { %339 = vmatpush.msrb.mxu0 %v250_v30 }
  0x3f   :  { %340 = vmatpush.msrb.mxu0 %v249_v31 }
  0x41   :  { %341 = vmatpush.msrb.mxu0 %v248_v32 }
  0x74   :  { %v30_v39 = vpop.permute.xlu0 %29  ;;  %v51_v40 = vpop.permute.xlu1 %50 }
  0x75   :  { %36 = vst.msk [vmem:[#allocation2] sm:$0xff] %vm35_vm1, %v30_v39 }
  0x76   :  { %56 = vst.msk [vmem:[#allocation2 + $0x20] sm:$0xff] %vm35_vm1, %v51_v40 }
  0x7c   :  { %v32_v54 = vpop.permute.xlu0 %31  ;;  %v62_v55 = vld [vmem:[#allocation2] sm:$0xff]  ;;  %v53_v56 = vpop.permute.xlu1 %52 }
  0x7d   :  { %37 = vst.msk [vmem:[#allocation2 + $0x10] sm:$0xff] %vm35_vm1, %v32_v54  ;;  %126 = vmatmul.f32.vlgmr.msra.gmra.mxu0 %v62_v55  ;;  %v66_v2 = vld [vmem:[#allocation2 + $0x20] sm:$0xff] }
  0x7e   :  { %57 = vst.msk [vmem:[#allocation2 + $0x30] sm:$0xff] %vm35_vm1, %v53_v56 }
  0x84   :  { %v64_v1 = vld [vmem:[#allocation2 + $0x10] sm:$0xff] }
  0x85   :  { %129 = vmatmul.f32.gmra.mxu0 %v64_v1  ;;  %v68_v3 = vld [vmem:[#allocation2 + $0x30] sm:$0xff] }
  0x8d   :  { %132 = vmatmul.f32.gmra.mxu0 %v66_v2 }
  0x91   :  { %v156_v33 = vpop.f32.mrf.mxu1 }
  0x95   :  { %135 = vmatmul.f32.gmra.mxu0 %v68_v3 }
  0x99   :  { %v159_v38 = vpop.f32.mrf.mxu1 }
  0xa1   :  { %v162_v45 = vpop.f32.mrf.mxu1 }
  0xa9   :  { %v165_v54 = vpop.f32.mrf.mxu1 }
  0xfa   :  { %v127_v35 = vpop.f32.mrf.mxu0 }
  0xfb   :  { %v128_v36 = vadd.f32 %v389_v34, %v127_v35 }
  0xfd   :  { %v157_v37 = vadd.f32 %v156_v33, %v128_v36 }
  0xff   :  { %v168_v39 = vmax.f32 %v157_v37, 0.0 }
 0x101   :  { %174 = vst [vmem:[#allocation3 + $0x1] sm:$0xff] %v168_v39  ;;  %313 = vmatmul.f32.vlgmr.msra.gmra.mxu3 %v168_v39 }
 0x102   :  { %v130_v40 = vpop.f32.mrf.mxu0 }
 0x103   :  { %v131_v41 = vadd.f32 %v389_v34, %v130_v40 }
 0x105   :  { %v160_v42 = vadd.f32 %v159_v38, %v131_v41 }
 0x107   :  { %v169_v43 = vmax.f32 %v160_v42, 0.0 }
 0x108   :  { %v180_v44 = vld [vmem:[#allocation3] sm:$0xff] }
 0x109   :  { %175 = vst [vmem:[#allocation3 + $0x9] sm:$0xff] %v169_v43  ;;  %284 = vmatmul.f32.vlgmr.msra.gmra.mxu2 %v180_v44  ;;  %316 = vmatmul.f32.gmra.mxu3 %v169_v43 }
 0x10a   :  { %v133_v46 = vpop.f32.mrf.mxu0 }
 0x10b   :  { %v134_v47 = vadd.f32 %v389_v34, %v133_v46 }
 0x10d   :  { %v163_v48 = vadd.f32 %v162_v45, %v134_v47 }
 0x10f   :  { %v170_v49 = vmax.f32 %v163_v48, 0.0 }
 0x110   :  { %v181_v50 = vld [vmem:[#allocation3 + $0x8] sm:$0xff] }
 0x111   :  { %v188_v51 = vld [vmem:[#allocation3 + $0x2] sm:$0xff]  ;;  %v189_v52 = vld [vmem:[#allocation3 + $0xa] sm:$0xff]  ;;  %178 = vst [vmem:[#allocation3 + $0x13] sm:$0xff] %v170_v49  ;;  %287 = vmatmul.f32.gmra.mxu2 %v181_v50  ;;  %319 = vmatmul.f32.gmra.mxu3 %v170_v49 }
 0x112   :  { %342 = vmatmul.f32.vlgmr.msrb.gmra.mxu0 %v188_v51  ;;  %345 = vmatmul.f32.vlgmr.msrb.gmra.mxu1 %v189_v52  ;;  %v136_v53 = vpop.f32.mrf.mxu0 }
 0x113   :  { %v137_v55 = vadd.f32 %v389_v34, %v136_v53 }
 0x115   :  { %v166_v56 = vadd.f32 %v165_v54, %v137_v55 }
 0x117   :  { %v171_v57 = vmax.f32 %v166_v56, 0.0 }
 0x118   :  { %v192_v58 = vld [vmem:[#allocation3 + $0x12] sm:$0xff] }
 0x119   :  { %179 = vst [vmem:[#allocation3 + $0x1b] sm:$0xff] %v171_v57  ;;  %290 = vmatmul.f32.gmra.mxu2 %v192_v58  ;;  %322 = vmatmul.f32.gmra.mxu3 %v171_v57 }
 0x120   :  { %v193_v59 = vld [vmem:[#allocation3 + $0x1a] sm:$0xff] }
 0x121   :  { %v200_v60 = vld [vmem:[#allocation3 + $0x14] sm:$0xff]  ;;  %293 = vmatmul.f32.gmra.mxu2 %v193_v59  ;;  %v201_v61 = vld [vmem:[#allocation3 + $0x1c] sm:$0xff] }
 0x122   :  { %348 = vmatmul.f32.gmra.mxu1 %v200_v60 }
 0x12a   :  { %351 = vmatmul.f32.gmra.mxu1 %v201_v61 }
 0x184   :  { %v314_v62 = vpop.f32.mrf.mxu3 }
 0x18c   :  { %v285_v0 = vpop.f32.mrf.mxu2  ;;  %v317_v5 = vpop.f32.mrf.mxu3 }
 0x18d   :  { %v286_v1 = vadd.f32 %v390_v63, %v285_v0 }
 0x18f   :  { %v315_v2 = vadd.f32 %v314_v62, %v286_v1  ;;  %v343_v3 = vpop.f32.mrf.mxu0  ;;  %v346_v9 = vpop.f32.mrf.mxu1 }
 0x191   :  { %v344_v4 = vadd.f32 %v343_v3, %v315_v2 }
 0x193   :  { %v355_v6 = vmax.f32 %v344_v4, 0.0 }
 0x194   :  { %v288_v7 = vpop.f32.mrf.mxu2  ;;  %v320_v14 = vpop.f32.mrf.mxu3 }
 0x195   :  { %359 = vst [vmem:[%s714_s5] sm:$0xff] %v355_v6  ;;  %v289_v8 = vadd.f32 %v390_v63, %v288_v7 }
 0x197   :  { %v318_v10 = vadd.f32 %v317_v5, %v289_v8 }
 0x199   :  { %v347_v11 = vadd.f32 %v346_v9, %v318_v10 }
 0x19b   :  { %v356_v12 = vmax.f32 %v347_v11, 0.0 }
 0x19c   :  { %v291_v13 = vpop.f32.mrf.mxu2  ;;  %v323_v22 = vpop.f32.mrf.mxu3 }
 0x19d   :  { %360 = vst [vmem:[%s714_s5 + $0x8] sm:$0xff] %v356_v12  ;;  %v292_v15 = vadd.f32 %v390_v63, %v291_v13 }
 0x19f   :  { %v349_v16 = vpop.f32.mrf.mxu1  ;;  %v321_v17 = vadd.f32 %v320_v14, %v292_v15 }
 0x1a1   :  { %v350_v18 = vadd.f32 %v349_v16, %v321_v17 }
 0x1a3   :  { %v357_v19 = vmax.f32 %v350_v18, 0.0 }
 0x1a4   :  { %v294_v20 = vpop.f32.mrf.mxu2 }
 0x1a5   :  { %361 = vst [vmem:[%s714_s5 + $0x10] sm:$0xff] %v357_v19  ;;  %v295_v21 = vadd.f32 %v390_v63, %v294_v20 }
 0x1a7   :  { %v324_v23 = vadd.f32 %v323_v22, %v295_v21  ;;  %v352_v24 = vpop.f32.mrf.mxu1 }
 0x1a9   :  { %v353_v25 = vadd.f32 %v352_v24, %v324_v23 }
 0x1ab   :  { %v358_v26 = vmax.f32 %v353_v25, 0.0 }
 0x1ad   :  { %362 = vst [vmem:[%s714_s5 + $0x18] sm:$0xff] %v358_v26 }

</bundles_post_ra>
